<compile_context>
chip_gen: v5e
topology: v5e:2x2
jax: 0.10.0
libtpu: 0.0.40
codegen_flags: <defaults>
</compile_context>

<pallas_src>
import functools

import numpy as np
import jax
import jax.numpy as jnp
from jax.experimental import pallas as pl
from jax.experimental.pallas import tpu as pltpu


def _dws_weights_kernel(emb_blk_ref, emb_all_ref, sqc_ref, sqr_ref, tc_ref, tr_ref,
                        w_ref, *, C, B_real, cutoff, nonzero_loss_cutoff):
    """One (tm, B_pad) row block of the distance-weighted sampling weight matrix.

    emb_blk_ref: (tm, C)     bf16  row block of embeddings
    emb_all_ref: (B_pad, C)  bf16  full embeddings (resident across the grid)
    sqc_ref    : (tm, 1)     f32   squared norms of the row block
    sqr_ref    : (1, B_pad)  f32   squared norms of all rows
    tc_ref     : (tm, 1)     i32   targets of the row block
    tr_ref     : (1, B_pad)  i32   targets of all rows
    w_ref      : (tm, B_pad) f32   row-normalised sampling weights (output)
    """
    # --- Gram block on the MXU: bf16 operands, f32 accumulation ---
    gram = jax.lax.dot_general(
        emb_blk_ref[...], emb_all_ref[...], (((1,), (1,)), ((), ())),
        preferred_element_type=jnp.float32)                     # (tm, B_pad)

    # --- squared pairwise distances (no sqrt: everything stays in squared space) ---
    dist_sq = sqc_ref[...] + sqr_ref[...] - 2.0 * gram          # (tm, B_pad)

    tm, Bp = w_ref.shape
    col = jax.lax.broadcasted_iota(jnp.int32, (tm, Bp), 1)
    col_valid = col < B_real
    # safe finite placeholder for padded columns (they are masked out below)
    dist_sq = jnp.where(col_valid, dist_sq, jnp.float32(1.0))

    # clamp(distance, min=cutoff)  <=>  clamp(dist_sq, min=cutoff^2); upper clip keeps
    # log(1 - d^2/4) finite where the reference would produce -inf/NaN (distance >= 2).
    lo = jnp.float32(cutoff * cutoff)
    hi = jnp.float32(4.0 - 1e-3)
    dist_sq_c = jnp.clip(dist_sq, lo, hi)

    # log_w = (2 - C) * log d - (C - 3)/2 * log(1 - d^2/4),  with log d = 0.5 * log d^2
    log_w = (0.5 * (2.0 - float(C))) * jnp.log(dist_sq_c) \
            - (float(C - 3) / 2.0) * jnp.log(1.0 - 0.25 * dist_sq_c)

    # Per-row max: identical after row-normalisation, keeps the kernel row-tileable.
    weights = jnp.exp(log_w - jnp.max(log_w, axis=1, keepdims=True))

    # mask: different identity AND inside the nonzero-loss cutoff AND a real column
    unequal = tc_ref[...] != tr_ref[...]                        # (tm, B_pad)
    in_range = dist_sq_c < jnp.float32(nonzero_loss_cutoff * nonzero_loss_cutoff)
    mask = jnp.logical_and(jnp.logical_and(unequal, in_range), col_valid)
    weights = jnp.where(mask, weights, jnp.float32(0.0))

    # row-normalise with an EUP reciprocal (0/0 -> NaN row, handled host-side like torch)
    row_sum = jnp.sum(weights, axis=1, keepdims=True)           # (tm, 1)
    w_ref[...] = weights * pl.reciprocal(row_sum, approx=True)


def dws_weights(embedding, target, *, cutoff=0.5, nonzero_loss_cutoff=1.4, tm=128):
    """Pallas wrapper: returns the (B, B) row-normalised sampling-weight matrix."""
    B, C = embedding.shape
    emb = jnp.asarray(embedding, dtype=jnp.float32)
    tgt = jnp.asarray(target, dtype=jnp.int32)

    # Pad the batch dim to a multiple of 128 so the output last dim is lane-dense.
    B_pad = max(128, ((B + 127) // 128) * 128)
    pad = B_pad - B
    emb_p = jnp.pad(emb, ((0, pad), (0, 0)))
    tgt_p = jnp.pad(tgt, (0, pad), constant_values=-1)

    sq = jnp.sum(emb_p * emb_p, axis=1)            # f32 squared norms (full precision)
    sq_col = sq.reshape(B_pad, 1)
    sq_row = sq.reshape(1, B_pad)
    t_col = tgt_p.reshape(B_pad, 1)
    t_row = tgt_p.reshape(1, B_pad)
    emb_bf = emb_p.astype(jnp.bfloat16)            # bf16 MXU operands, f32 accumulate

    tm = min(tm, B_pad)                            # B_pad is a multiple of 128 >= tm
    grid = (B_pad // tm,)

    kernel = functools.partial(
        _dws_weights_kernel, C=C, B_real=B,
        cutoff=float(cutoff), nonzero_loss_cutoff=float(nonzero_loss_cutoff))

    # Explicit VMEM budget: resident full embedding + double-buffered row block /
    # output tile + elementwise temporaries, with headroom. Capped at 64 MiB (v7x).
    vmem_est = (B_pad * C * 2 + 2 * tm * C * 2 + 2 * tm * B_pad * 4
                + 8 * tm * B_pad * 4)
    vmem_limit = int(min(max(2 * vmem_est, 16 << 20), 64 << 20))

    w_pad = pl.pallas_call(
        kernel,
        out_shape=jax.ShapeDtypeStruct((B_pad, B_pad), jnp.float32),
        grid=grid,
        in_specs=[
            pl.BlockSpec((tm, C), lambda i: (i, 0)),       # row block of embeddings
            pl.BlockSpec((B_pad, C), lambda i: (0, 0)),    # full embeddings (resident)
            pl.BlockSpec((tm, 1), lambda i: (i, 0)),       # row-block squared norms
            pl.BlockSpec((1, B_pad), lambda i: (0, 0)),    # all squared norms (row)
            pl.BlockSpec((tm, 1), lambda i: (i, 0)),       # row-block targets
            pl.BlockSpec((1, B_pad), lambda i: (0, 0)),    # all targets (row)
        ],
        out_specs=pl.BlockSpec((tm, B_pad), lambda i: (i, 0)),
        compiler_params=pltpu.CompilerParams(
            dimension_semantics=("parallel",),
            vmem_limit_bytes=vmem_limit),
    )(emb_bf, emb_bf, sq_col, sq_row, t_col, t_row)

    return w_pad[:B, :B]


def distance_weighted_sampling(embedding, target, *, cutoff=0.5, nonzero_loss_cutoff=1.4,
                               rng_seed=0):
    """Full forward pass, mirroring the PyTorch module's output dict.

    The weight-matrix computation runs in the Pallas kernel; the sampling loop
    (np.random.choice over data-dependent index sets) is host-side, as in the reference.
    """
    B, C = embedding.shape
    weights = jax.block_until_ready(
        dws_weights(embedding, target, cutoff=cutoff, nonzero_loss_cutoff=nonzero_loss_cutoff))

    np_weights = np.asarray(weights)
    target_np = np.asarray(target)
    unequal_np = target_np.reshape(-1, 1) != target_np.reshape(1, -1)

    # TODO(synk): data-dependent np.random.choice sampling has no clean Pallas
    # equivalent; kept host-side exactly like the PyTorch reference (seeded here).
    rng = np.random.RandomState(rng_seed)
    a_indices, p_indices, n_indices = [], [], []
    for i in range(B):
        same = (1 - unequal_np[i]).nonzero()[0]
        row = np_weights[i].astype(np.float64)
        s = row.sum()
        if not np.isfinite(s) or s <= 0.0:
            # mirrors the reference's NaN fallback: uniform over different-identity rows
            row = unequal_np[i].astype(np.float64)
            row /= row.sum()
        else:
            # renormalise so np.random.choice's sum-to-1 tolerance is met with f32 inputs
            row = row / s
        try:
            n_indices += rng.choice(B, len(same) - 1, p=row, replace=False).tolist()
        except ValueError:
            n_indices += rng.choice(B, len(same) - 1, p=row).tolist()
        for j in same:
            if j != i:
                a_indices.append(int(i))
                p_indices.append(int(j))

    emb = jnp.asarray(embedding)
    a_idx = jnp.asarray(a_indices, dtype=jnp.int32)
    p_idx = jnp.asarray(p_indices, dtype=jnp.int32)
    n_idx = jnp.asarray(n_indices, dtype=jnp.int32)
    return {
        'anchor_embeddings': emb[a_idx],
        'negative_embeddings': emb[n_idx],
        'positive_embeddings': emb[p_idx],
        'a_indices': a_indices,
        'n_indices': n_indices,
        'p_indices': p_indices,
    }


if __name__ == "__main__":
    key = jax.random.PRNGKey(0)
    B, C = 8, 32
    k_emb, _ = jax.random.split(key)
    embedding = jax.random.normal(k_emb, (B, C), dtype=jnp.float32)
    # distance-weighted sampling assumes unit-norm embeddings (distances in [0, 2])
    embedding = embedding / jnp.linalg.norm(embedding, axis=1, keepdims=True)
    # each identity appears twice so every anchor has a positive
    target = jnp.array([0, 0, 1, 1, 2, 2, 3, 3], dtype=jnp.int32)

    out = distance_weighted_sampling(embedding, target)
    jax.block_until_ready(out['anchor_embeddings'])
    jax.block_until_ready(out['negative_embeddings'])
    jax.block_until_ready(out['positive_embeddings'])

    assert out['anchor_embeddings'].shape == (len(out['a_indices']), C)
    assert out['negative_embeddings'].shape == (len(out['n_indices']), C)
    assert out['positive_embeddings'].shape == (len(out['p_indices']), C)
    print("KERNEL_OK")
</pallas_src>

<mosaic_0001>
module attributes {stable_mosaic.version = 11 : i64} {
  func.func @_dws_weights_kernel(%arg0: i32, %arg1: memref<128x32xbf16, #tpu.memory_space<vmem>>, %arg2: memref<128x32xbf16, #tpu.memory_space<vmem>>, %arg3: memref<128x1xf32, #tpu.memory_space<vmem>>, %arg4: memref<1x128xf32, #tpu.memory_space<vmem>>, %arg5: memref<128x1xi32, #tpu.memory_space<vmem>>, %arg6: memref<1x128xi32, #tpu.memory_space<vmem>>, %arg7: memref<128x128xf32, #tpu.memory_space<vmem>>) attributes {dimension_semantics = [#tpu.dimension_semantics<parallel>], iteration_bounds = array<i64: 1>, scalar_prefetch = 0 : i64, scratch_operands = 0 : i64, tpu.core_type = #tpu.core_type<tc>, window_params = [{transform_indices = @transform_0, window_bounds = array<i64: 128, 32>}, {pipeline_mode = #tpu.pipeline_mode<synchronous>, transform_indices = @transform_1, window_bounds = array<i64: 128, 32>}, {transform_indices = @transform_2, window_bounds = array<i64: 128, 1>}, {pipeline_mode = #tpu.pipeline_mode<synchronous>, transform_indices = @transform_3, window_bounds = array<i64: 1, 128>}, {transform_indices = @transform_4, window_bounds = array<i64: 128, 1>}, {pipeline_mode = #tpu.pipeline_mode<synchronous>, transform_indices = @transform_5, window_bounds = array<i64: 1, 128>}, {transform_indices = @transform_6, window_bounds = array<i64: 128, 128>}]} {
    %c0 = arith.constant 0 : index
    %c0_0 = arith.constant 0 : index
    %0 = vector.load %arg1[%c0, %c0_0] : memref<128x32xbf16, #tpu.memory_space<vmem>>, vector<128x32xbf16>
    %c0_1 = arith.constant 0 : index
    %c0_2 = arith.constant 0 : index
    %1 = vector.load %arg2[%c0_1, %c0_2] : memref<128x32xbf16, #tpu.memory_space<vmem>>, vector<128x32xbf16>
    %cst = arith.constant dense<0.000000e+00> : vector<128x128xf32>
    %2 = tpu.matmul %0, %1, %cst {dimension_numbers = #tpu.dot_dimension_numbers<[1], [1], [0], [0], [0, 0, 1, 0], [], []>} : vector<128x32xbf16>, vector<128x32xbf16>, vector<128x128xf32> -> vector<128x128xf32>
    %c0_3 = arith.constant 0 : index
    %c0_4 = arith.constant 0 : index
    %3 = vector.load %arg3[%c0_3, %c0_4] : memref<128x1xf32, #tpu.memory_space<vmem>>, vector<128x1xf32>
    %c0_5 = arith.constant 0 : index
    %c0_6 = arith.constant 0 : index
    %4 = vector.load %arg4[%c0_5, %c0_6] : memref<1x128xf32, #tpu.memory_space<vmem>>, vector<1x128xf32>
    %5 = vector.broadcast %3 : vector<128x1xf32> to vector<128x128xf32>
    %6 = vector.broadcast %4 : vector<1x128xf32> to vector<128x128xf32>
    %7 = arith.addf %5, %6 : vector<128x128xf32>
    %cst_7 = arith.constant 2.000000e+00 : f32
    %8 = vector.broadcast %cst_7 : f32 to vector<128x128xf32>
    %9 = arith.mulf %8, %2 : vector<128x128xf32>
    %10 = arith.subf %7, %9 : vector<128x128xf32>
    %11 = tpu.iota {dimensions = array<i32: 1>} : vector<128x128xi32>
    %c8_i32 = arith.constant 8 : i32
    %12 = vector.broadcast %c8_i32 : i32 to vector<128x128xi32>
    %13 = arith.cmpi slt, %11, %12 : vector<128x128xi32>
    %cst_8 = arith.constant 1.000000e+00 : f32
    %14 = vector.broadcast %cst_8 : f32 to vector<128x128xf32>
    %15 = arith.select %13, %10, %14 : vector<128x128xi1>, vector<128x128xf32>
    %cst_9 = arith.constant 2.500000e-01 : f32
    %cst_10 = arith.constant 3.999000e+00 : f32
    %16 = vector.broadcast %cst_9 : f32 to vector<128x128xf32>
    %17 = arith.maximumf %16, %15 : vector<128x128xf32>
    %18 = vector.broadcast %cst_10 : f32 to vector<128x128xf32>
    %19 = arith.minimumf %18, %17 : vector<128x128xf32>
    %20 = math.log %19 : vector<128x128xf32>
    %cst_11 = arith.constant -1.500000e+01 : f32
    %21 = vector.broadcast %cst_11 : f32 to vector<128x128xf32>
    %22 = arith.mulf %21, %20 : vector<128x128xf32>
    %cst_12 = arith.constant 2.500000e-01 : f32
    %23 = vector.broadcast %cst_12 : f32 to vector<128x128xf32>
    %24 = arith.mulf %23, %19 : vector<128x128xf32>
    %cst_13 = arith.constant 1.000000e+00 : f32
    %25 = vector.broadcast %cst_13 : f32 to vector<128x128xf32>
    %26 = arith.subf %25, %24 : vector<128x128xf32>
    %27 = math.log %26 : vector<128x128xf32>
    %cst_14 = arith.constant 1.450000e+01 : f32
    %28 = vector.broadcast %cst_14 : f32 to vector<128x128xf32>
    %29 = arith.mulf %28, %27 : vector<128x128xf32>
    %30 = arith.subf %22, %29 : vector<128x128xf32>
    %cst_15 = arith.constant dense<0xFF800000> : vector<128xf32>
    %31 = vector.multi_reduction <maximumf>, %30, %cst_15 [1] : vector<128x128xf32> to vector<128xf32>
    %32 = vector.shape_cast %31 : vector<128xf32> to vector<128x1xf32>
    %33 = vector.broadcast %32 : vector<128x1xf32> to vector<128x128xf32>
    %34 = arith.subf %30, %33 : vector<128x128xf32>
    %35 = math.exp %34 : vector<128x128xf32>
    %c0_16 = arith.constant 0 : index
    %c0_17 = arith.constant 0 : index
    %36 = vector.load %arg5[%c0_16, %c0_17] : memref<128x1xi32, #tpu.memory_space<vmem>>, vector<128x1xi32>
    %c0_18 = arith.constant 0 : index
    %c0_19 = arith.constant 0 : index
    %37 = vector.load %arg6[%c0_18, %c0_19] : memref<1x128xi32, #tpu.memory_space<vmem>>, vector<1x128xi32>
    %38 = vector.broadcast %36 : vector<128x1xi32> to vector<128x128xi32>
    %39 = vector.broadcast %37 : vector<1x128xi32> to vector<128x128xi32>
    %40 = arith.cmpi ne, %38, %39 : vector<128x128xi32>
    %cst_20 = arith.constant 1.960000e+00 : f32
    %41 = vector.broadcast %cst_20 : f32 to vector<128x128xf32>
    %42 = arith.cmpf olt, %19, %41 : vector<128x128xf32>
    %43 = arith.andi %40, %42 : vector<128x128xi1>
    %44 = arith.andi %43, %13 : vector<128x128xi1>
    %cst_21 = arith.constant 0.000000e+00 : f32
    %45 = vector.broadcast %cst_21 : f32 to vector<128x128xf32>
    %46 = arith.select %44, %35, %45 : vector<128x128xi1>, vector<128x128xf32>
    %cst_22 = arith.constant dense<0.000000e+00> : vector<128xf32>
    %47 = vector.multi_reduction <add>, %46, %cst_22 [1] : vector<128x128xf32> to vector<128xf32>
    %48 = vector.shape_cast %47 : vector<128xf32> to vector<128x1xf32>
    %49 = tpu.reciprocal %48 {approx = true} : vector<128x1xf32> -> vector<128x1xf32>
    %50 = vector.broadcast %49 : vector<128x1xf32> to vector<128x128xf32>
    %51 = arith.mulf %46, %50 : vector<128x128xf32>
    %c0_23 = arith.constant 0 : index
    %c0_24 = arith.constant 0 : index
    %52 = vector.load %arg7[%c0_23, %c0_24] : memref<128x128xf32, #tpu.memory_space<vmem>>, vector<128x128xf32>
    tpu.vector_store %arg7[%c0_23, %c0_24], %51 {strides = array<i32>} : memref<128x128xf32, #tpu.memory_space<vmem>>, vector<128x128xf32>,
    return
  }
  func.func @transform_0(%arg0: i32) -> (i32, i32) {
    %c0_i32 = arith.constant 0 : i32
    %c0_i32_0 = arith.constant 0 : i32
    return %arg0, %c0_i32 : i32, i32
  }
  func.func @transform_1(%arg0: i32) -> (i32, i32) {
    %c0_i32 = arith.constant 0 : i32
    %c0_i32_0 = arith.constant 0 : i32
    %c0_i32_1 = arith.constant 0 : i32
    return %c0_i32, %c0_i32_0 : i32, i32
  }
  func.func @transform_2(%arg0: i32) -> (i32, i32) {
    %c0_i32 = arith.constant 0 : i32
    %c0_i32_0 = arith.constant 0 : i32
    return %arg0, %c0_i32 : i32, i32
  }
  func.func @transform_3(%arg0: i32) -> (i32, i32) {
    %c0_i32 = arith.constant 0 : i32
    %c0_i32_0 = arith.constant 0 : i32
    %c0_i32_1 = arith.constant 0 : i32
    return %c0_i32, %c0_i32_0 : i32, i32
  }
  func.func @transform_4(%arg0: i32) -> (i32, i32) {
    %c0_i32 = arith.constant 0 : i32
    %c0_i32_0 = arith.constant 0 : i32
    return %arg0, %c0_i32 : i32, i32
  }
  func.func @transform_5(%arg0: i32) -> (i32, i32) {
    %c0_i32 = arith.constant 0 : i32
    %c0_i32_0 = arith.constant 0 : i32
    %c0_i32_1 = arith.constant 0 : i32
    return %c0_i32, %c0_i32_0 : i32, i32
  }
  func.func @transform_6(%arg0: i32) -> (i32, i32) {
    %c0_i32 = arith.constant 0 : i32
    %c0_i32_0 = arith.constant 0 : i32
    return %arg0, %c0_i32 : i32, i32
  }
}

</mosaic_0001>

<bundles_post_ra>
// kernel: tpu_custom_call.1
= control target key start
LH: loop header
LB: loop body
LE: loop exit
PB: predicated region body
PF: predicated region fallthrough
CT: control target
= control target key end

     0   :  { %vm136_vm0 = vcmask 261120   ;;  %v1176_v3 = vmov 0   ;;  %s1767_s0 = inlined_call_operand.vmem [shape: bf16[128,32], index: 0, kind: input, shape index: {}]   ;;  %s1768_s1 = inlined_call_operand.vmem [shape: bf16[128,32], index: 1, kind: input, shape index: {}]   ;;  %s1769_s2 = inlined_call_operand.vmem [shape: f32[128,1], index: 2, kind: input, shape index: {}]   ;;  %s1770_s3 = inlined_call_operand.vmem [shape: f32[1,128], index: 3, kind: input, shape index: {}]   ;;  %s1771_s4 = inlined_call_operand.vmem [shape: s32[128,1], index: 4, kind: input, shape index: {}]   ;;  %s1772_s5 = inlined_call_operand.vmem [shape: s32[1,128], index: 5, kind: input, shape index: {}]   ;;  %s1773_s6 = inlined_call_operand.hbm [shape: f32[128,128], index: 6, kind: output, shape index: {}]  }
   0x1   :  { %v236_v0 = vld [vmem:[%s1769_s2 + $0x10] sm:$0xff]  ;;  %v234_v1 = vld [vmem:[%s1769_s2] sm:$0xff]  ;;  %v988_v2 = vld [vmem:[%s1768_s1 + $0x38] sm:$0xff]  ;;  %1018 = vset.pattern.permute.xlu1 %v1176_v3  ;;  %1017 = vset.pattern.permute.xlu0 %v1176_v3 }
   0x2   :  { %263 = vperm.xlu1 %1018, %v236_v0   ;;  %253 = vperm.xlu0 %1017, %v234_v1   ;;  %v183_v4 = vsel %vm136_vm0, %v988_v2, 0  ;;  %v238_v5 = vld [vmem:[%s1769_s2 + $0x20] sm:$0xff]  ;;  %v987_v6 = vld [vmem:[%s1768_s1 + $0x30] sm:$0xff]  ;;  %v237_v7 = vld [vmem:[%s1769_s2 + $0x18] sm:$0xff] }
   0x3   :  { %185 = vmatpush.bf16.xpose.msra.mxu0 %v183_v4  ;;  %989 = vmatpush.bf16.xpose.msra.mxu1 %v183_v4  ;;  %v235_v8 = vld [vmem:[%s1769_s2 + $0x8] sm:$0xff] }
   0x4   :  { %990 = vmatpush.bf16.xpose.msra.mxu2 %v183_v4  ;;  %991 = vmatpush.bf16.xpose.msra.mxu3 %v183_v4 }
   0x5   :  { %1019 = vset.pattern.permute.xlu2 %v1176_v3 }
   0x6   :  { %273 = vperm.xlu2 %1019, %v238_v5  }
   0x7   :  { %11 = vsyncpa [#allocation3], 0  ;;  %v180_v9 = vsel %vm136_vm0, %v987_v6, 0  ;;  %v239_v10 = vld [vmem:[%s1769_s2 + $0x28] sm:$0xff]  ;;  %v241_v12 = vld [vmem:[%s1769_s2 + $0x38] sm:$0xff]  ;;  %v382_v63 = vlaneseq  ;;  %s889_s21 = sshll.u32 %s1773_s6, 4  ;;  %s890_s21 = int_to_ptr.hbm [resolvable:$true] %s889_s21 }
   0x8   :  { %v986_v11 = vld [vmem:[%s1768_s1 + $0x28] sm:$0xff]  ;;  %v240_v13 = vld [vmem:[%s1769_s2 + $0x30] sm:$0xff]  ;;  %v242_v15 = vld [vmem:[%s1769_s2 + $0x40] sm:$0xff]  ;;  %s1178_s22 = smov 128   ;;  %s1179_s23 = smov 8  }
   0x9   :  { %v177_v14 = vsel %vm136_vm0, %v986_v11, 0  ;;  %v985_v16 = vld [vmem:[%s1768_s1 + $0x20] sm:$0xff]  ;;  %v244_v17 = vld [vmem:[%s1769_s2 + $0x50] sm:$0xff]  ;;  %v243_v18 = vld [vmem:[%s1769_s2 + $0x48] sm:$0xff]  ;;  %v1371_v2 = vand.u32 127, %v382_v63 }
   0xa   :  { %268 = vperm.xlu1 %1018, %v237_v7   ;;  %258 = vperm.xlu0 %1017, %v235_v8   ;;  %v174_v19 = vsel %vm136_vm0, %v985_v16, 0  ;;  %v245_v20 = vld [vmem:[%s1769_s2 + $0x58] sm:$0xff]  ;;  %v247_v22 = vld [vmem:[%s1769_s2 + $0x68] sm:$0xff]  ;;  %v246_v23 = vld [vmem:[%s1769_s2 + $0x60] sm:$0xff] }
   0xb   :  { %186 = vmatpush.bf16.xpose.msra.mxu0 %v180_v9  ;;  %992 = vmatpush.bf16.xpose.msra.mxu1 %v180_v9  ;;  %v984_v21 = vld [vmem:[%s1768_s1 + $0x18] sm:$0xff]  ;;  %v248_v25 = vld [vmem:[%s1769_s2 + $0x70] sm:$0xff]  ;;  %v657_v27 = vld [vmem:[%s1771_s4] sm:$0xff]  ;;  %vm384_vm1 = vcmp.lt.s32.totalorder %v1371_v2, 8 }
   0xc   :  { %993 = vmatpush.bf16.xpose.msra.mxu2 %v180_v9  ;;  %994 = vmatpush.bf16.xpose.msra.mxu3 %v180_v9  ;;  %v171_v24 = vsel %vm136_vm0, %v984_v21, 0  ;;  %v983_v26 = vld [vmem:[%s1768_s1 + $0x10] sm:$0xff]  ;;  %v249_v28 = vld [vmem:[%s1769_s2 + $0x78] sm:$0xff]  ;;  %v658_v30 = vld [vmem:[%s1771_s4 + $0x8] sm:$0xff] }
   0xd   :  { %v168_v29 = vsel %vm136_vm0, %v983_v26, 0  ;;  %v982_v31 = vld [vmem:[%s1768_s1 + $0x8] sm:$0xff]  ;;  %v660_v32 = vld [vmem:[%s1771_s4 + $0x18] sm:$0xff]  ;;  %v659_v33 = vld [vmem:[%s1771_s4 + $0x10] sm:$0xff] }
   0xe   :  { %278 = vperm.xlu2 %1019, %v239_v10   ;;  %v165_v34 = vsel %vm136_vm0, %v982_v31, 0  ;;  %v662_v35 = vld [vmem:[%s1771_s4 + $0x28] sm:$0xff]  ;;  %v981_v36 = vld [vmem:[%s1768_s1] sm:$0xff]  ;;  %v663_v37 = vld [vmem:[%s1771_s4 + $0x30] sm:$0xff] }
   0xf   :  { %v661_v38 = vld [vmem:[%s1771_s4 + $0x20] sm:$0xff]  ;;  %v162_v39 = vsel %vm136_vm0, %v981_v36, 0  ;;  %v666_v41 = vld [vmem:[%s1771_s4 + $0x48] sm:$0xff]  ;;  %v664_v42 = vld [vmem:[%s1771_s4 + $0x38] sm:$0xff] }
  0x10   :  { %v665_v40 = vld [vmem:[%s1771_s4 + $0x40] sm:$0xff]  ;;  %v975_v44 = vld [vmem:[%s1767_s0 + $0x10] sm:$0xff]  ;;  %v668_v47 = vld [vmem:[%s1771_s4 + $0x58] sm:$0xff] }
  0x11   :  { %v973_v43 = vld [vmem:[%s1767_s0] sm:$0xff]  ;;  %v979_v46 = vld [vmem:[%s1767_s0 + $0x30] sm:$0xff]  ;;  %v974_v50 = vld [vmem:[%s1767_s0 + $0x8] sm:$0xff] }
  0x12   :  { %288 = vperm.xlu1 %1018, %v241_v12   ;;  %283 = vperm.xlu0 %1017, %v240_v13   ;;  %v977_v45 = vld [vmem:[%s1767_s0 + $0x20] sm:$0xff]  ;;  %v667_v49 = vld [vmem:[%s1771_s4 + $0x50] sm:$0xff]  ;;  %v976_v51 = vld [vmem:[%s1767_s0 + $0x18] sm:$0xff] }
  0x13   :  { %187 = vmatpush.bf16.xpose.msra.mxu0 %v177_v14  ;;  %995 = vmatpush.bf16.xpose.msra.mxu1 %v177_v14  ;;  %v669_v48 = vld [vmem:[%s1771_s4 + $0x60] sm:$0xff]  ;;  %v978_v52 = vld [vmem:[%s1767_s0 + $0x28] sm:$0xff]  ;;  %v980_v53 = vld [vmem:[%s1767_s0 + $0x38] sm:$0xff] }
  0x14   :  { %996 = vmatpush.bf16.xpose.msra.mxu2 %v177_v14  ;;  %997 = vmatpush.bf16.xpose.msra.mxu3 %v177_v14  ;;  %v1369_v1 = vld [vmem:[%s1770_s3] ss:$0 sm:$0xff] }
  0x16   :  { %293 = vperm.xlu2 %1019, %v242_v15  }
  0x1a   :  { %303 = vperm.xlu1 %1018, %v244_v17   ;;  %298 = vperm.xlu0 %1017, %v243_v18  }
  0x1b   :  { %188 = vmatpush.bf16.xpose.msra.mxu0 %v174_v19  ;;  %998 = vmatpush.bf16.xpose.msra.mxu1 %v174_v19 }
  0x1c   :  { %999 = vmatpush.bf16.xpose.msra.mxu2 %v174_v19  ;;  %1000 = vmatpush.bf16.xpose.msra.mxu3 %v174_v19 }
  0x1e   :  { %308 = vperm.xlu2 %1019, %v245_v20  }
  0x22   :  { %318 = vperm.xlu1 %1018, %v247_v22   ;;  %313 = vperm.xlu0 %1017, %v246_v23  }
  0x23   :  { %189 = vmatpush.bf16.xpose.msra.mxu0 %v171_v24  ;;  %1001 = vmatpush.bf16.xpose.msra.mxu1 %v171_v24 }
  0x24   :  { %1002 = vmatpush.bf16.xpose.msra.mxu2 %v171_v24  ;;  %1003 = vmatpush.bf16.xpose.msra.mxu3 %v171_v24 }
  0x26   :  { %323 = vperm.xlu2 %1019, %v248_v25  }
  0x2a   :  { %675 = vperm.xlu1 %1018, %v657_v27   ;;  %328 = vperm.xlu0 %1017, %v249_v28  }
  0x2b   :  { %190 = vmatpush.bf16.xpose.msra.mxu0 %v168_v29  ;;  %1004 = vmatpush.bf16.xpose.msra.mxu1 %v168_v29 }
  0x2c   :  { %1005 = vmatpush.bf16.xpose.msra.mxu2 %v168_v29  ;;  %1006 = vmatpush.bf16.xpose.msra.mxu3 %v168_v29 }
  0x2e   :  { %678 = vperm.xlu2 %1019, %v658_v30  }
  0x32   :  { %684 = vperm.xlu1 %1018, %v660_v32   ;;  %681 = vperm.xlu0 %1017, %v659_v33  }
  0x33   :  { %191 = vmatpush.bf16.xpose.msra.mxu0 %v165_v34  ;;  %1007 = vmatpush.bf16.xpose.msra.mxu1 %v165_v34 }
  0x34   :  { %1008 = vmatpush.bf16.xpose.msra.mxu2 %v165_v34  ;;  %1009 = vmatpush.bf16.xpose.msra.mxu3 %v165_v34 }
  0x36   :  { %690 = vperm.xlu2 %1019, %v662_v35  }
  0x3a   :  { %693 = vperm.xlu1 %1018, %v663_v37   ;;  %687 = vperm.xlu0 %1017, %v661_v38  }
  0x3b   :  { %192 = vmatpush.bf16.xpose.msra.mxu0 %v162_v39  ;;  %1010 = vmatpush.bf16.xpose.msra.mxu1 %v162_v39 }
  0x3c   :  { %1011 = vmatpush.bf16.xpose.msra.mxu2 %v162_v39  ;;  %1012 = vmatpush.bf16.xpose.msra.mxu3 %v162_v39 }
  0x3e   :  { %699 = vperm.xlu2 %1019, %v665_v40  }
  0x42   :  { %702 = vperm.xlu1 %1018, %v666_v41   ;;  %696 = vperm.xlu0 %1017, %v664_v42  }
  0x43   :  { %965 = vmatmul.msk.bf16.vlgmr.msra.gmra.mxu0 %vm136_vm0, %v973_v43  ;;  %967 = vmatmul.msk.bf16.vlgmr.msra.gmra.mxu1 %vm136_vm0, %v975_v44 }
  0x44   :  { %969 = vmatmul.msk.bf16.vlgmr.msra.gmra.mxu2 %vm136_vm0, %v977_v45  ;;  %971 = vmatmul.msk.bf16.vlgmr.msra.gmra.mxu3 %vm136_vm0, %v979_v46 }
  0x46   :  { %708 = vperm.xlu2 %1019, %v668_v47  }
  0x4a   :  { %711 = vperm.xlu1 %1018, %v669_v48   ;;  %705 = vperm.xlu0 %1017, %v667_v49  }
  0x53   :  { %966 = vmatmul.msk.bf16.gmra.mxu0 %vm136_vm0, %v974_v50  ;;  %968 = vmatmul.msk.bf16.gmra.mxu1 %vm136_vm0, %v976_v51 }
  0x54   :  { %970 = vmatmul.msk.bf16.gmra.mxu2 %vm136_vm0, %v978_v52  ;;  %972 = vmatmul.msk.bf16.gmra.mxu3 %vm136_vm0, %v980_v53 }
  0x60   :  { %v274_v55 = vpop.permute.xlu2 %273 }
  0x61   :  { %v338_v7 = vadd.f32 %v1369_v1, %v274_v55 }
  0x68   :  { %v279_v58 = vpop.permute.xlu2 %278 }
  0x69   :  { %v339_v15 = vadd.f32 %v1369_v1, %v279_v58 }
  0x70   :  { %v294_v61 = vpop.permute.xlu2 %293 }
  0x71   :  { %v342_v20 = vadd.f32 %v1369_v1, %v294_v61 }
  0x74   :  { %v254_v54 = vpop.permute.xlu0 %253  ;;  %v264_v56 = vpop.permute.xlu1 %263 }
  0x75   :  { %v334_v6 = vadd.f32 %v1369_v1, %v254_v54  ;;  %v1382_v19 = vadd.f32 %v1369_v1, %v264_v56 }
  0x78   :  { %v309_v3 = vpop.permute.xlu2 %308 }
  0x79   :  { %v1386_v21 = vadd.f32 %v1369_v1, %v309_v3 }
  0x7c   :  { %v259_v57 = vpop.permute.xlu0 %258  ;;  %v269_v59 = vpop.permute.xlu1 %268 }
  0x7d   :  { %v1394_v31 = vadd.f32 %v1369_v1, %v269_v59  ;;  %v335_v32 = vadd.f32 %v1369_v1, %v259_v57 }
  0x80   :  { %v324_v35 = vpop.permute.xlu2 %323 }
  0x81   :  { %v1403_v40 = vadd.f32 %v1369_v1, %v324_v35 }
  0x84   :  { %v284_v60 = vpop.permute.xlu0 %283  ;;  %v289_v62 = vpop.permute.xlu1 %288 }
  0x85   :  { %v1400_v39 = vadd.f32 %v1369_v1, %v289_v62  ;;  %v340_v50 = vadd.f32 %v1369_v1, %v284_v60 }
  0x8c   :  { %v299_v0 = vpop.permute.xlu0 %298  ;;  %v304_v12 = vpop.permute.xlu1 %303 }
  0x8d   :  { %v1416_v51 = vadd.f32 %v1369_v1, %v304_v12  ;;  %v343_v52 = vadd.f32 %v1369_v1, %v299_v0 }
  0x94   :  { %v314_v16 = vpop.permute.xlu0 %313  ;;  %v319_v53 = vpop.permute.xlu1 %318 }
  0x95   :  { %v346_v22 = vadd.f32 %v1369_v1, %v314_v16  ;;  %v347_v54 = vadd.f32 %v1369_v1, %v319_v53 }
  0xc0   :  { %v194_v4 = vpop.f32.mrf.mxu0  ;;  %v204_v5 = vpop.f32.mrf.mxu1 }
  0xc1   :  { %v350_v8 = vmul.f32 2.0, %v194_v4  ;;  %v354_v9 = vmul.f32 2.0, %v204_v5 }
  0xc3   :  { %v366_v10 = vsub.f32 %v334_v6, %v350_v8  ;;  %v370_v11 = vsub.f32 %v338_v7, %v354_v9  ;;  %v329_v9 = vpop.permute.xlu0 %328 }
  0xc5   :  { %v385_v13 = vsel %vm384_vm1, %v366_v10, 1.0  ;;  %v389_v14 = vsel %vm384_vm1, %v370_v11, 1.0 }
  0xc6   :  { %v401_v17 = vmax.f32 %v385_v13, 0.25  ;;  %v405_v18 = vmax.f32 %v389_v14, 0.25  ;;  %v1431_v13 = vadd.f32 %v1369_v1, %v329_v9 }
  0xc7   :  { %v214_v23 = vpop.f32.mrf.mxu2  ;;  %v224_v24 = vpop.f32.mrf.mxu3 }
  0xc8   :  { %v1389_v25 = vmin.f32 %v401_v17, 3.999  ;;  %v1391_v26 = vmin.f32 %v405_v18, 3.999  ;;  %v358_v27 = vmul.f32 2.0, %v214_v23  ;;  %v362_v28 = vmul.f32 2.0, %v224_v24  ;;  %v196_v29 = vpop.f32.mrf.mxu0  ;;  %v206_v30 = vpop.f32.mrf.mxu1 }
  0xc9   :  { %v351_v33 = vmul.f32 2.0, %v196_v29  ;;  %v355_v34 = vmul.f32 2.0, %v206_v30 }
  0xca   :  { %v374_v36 = vsub.f32 %v342_v20, %v358_v27  ;;  %v378_v37 = vsub.f32 %v346_v22, %v362_v28  ;;  %1022 = vlog2.f32 %v1389_v25  ;;  %v481_v38 = vmul.f32 0.25, %v1389_v25 }
  0xcb   :  { %v367_v41 = vsub.f32 %v335_v32, %v351_v33  ;;  %v371_v42 = vsub.f32 %v339_v15, %v355_v34  ;;  %1024 = vlog2.f32 %v1391_v26  ;;  %v1425_v59 = vmul.f32 0.25, %v1391_v26 }
  0xcc   :  { %v393_v43 = vsel %vm384_vm1, %v374_v36, 1.0  ;;  %v397_v44 = vsel %vm384_vm1, %v378_v37, 1.0  ;;  %v497_v45 = vsub.f32 1.0, %v481_v38  ;;  %vm739_vm11 = vcmp.lt.f32.partialorder %v1389_v25, 1.96 }
  0xcd   :  { %v409_v46 = vmax.f32 %v393_v43, 0.25  ;;  %v413_v47 = vmax.f32 %v397_v44, 0.25  ;;  %v386_v48 = vsel %vm384_vm1, %v367_v41, 1.0  ;;  %v390_v49 = vsel %vm384_vm1, %v371_v42, 1.0 }
  0xce   :  { %1026 = vlog2.f32 %v497_v45  ;;  %v402_v60 = vmax.f32 %v386_v48, 0.25  ;;  %v406_v62 = vmax.f32 %v390_v49, 0.25  ;;  %v501_v23 = vsub.f32 1.0, %v1425_v59 }
  0xcf   :  { %v1420_v55 = vmin.f32 %v409_v46, 3.999  ;;  %v1422_v56 = vmin.f32 %v413_v47, 3.999  ;;  %v216_v57 = vpop.f32.mrf.mxu2  ;;  %v226_v58 = vpop.f32.mrf.mxu3 }
  0xd0   :  { %v1023_v61 = vpop.eup %1022  ;;  %v359_v63 = vmul.f32 2.0, %v216_v57  ;;  %v363_v3 = vmul.f32 2.0, %v226_v58  ;;  %v199_v4 = vpop.f32.mrf.mxu0  ;;  %v1440_v24 = vmin.f32 %v402_v60, 3.999  ;;  %v1446_v28 = vmin.f32 %v406_v62, 3.999 }
  0xd1   :  { %v209_v0 = vpop.f32.mrf.mxu1  ;;  %v352_v5 = vmul.f32 2.0, %v199_v4  ;;  %v434_v7 = vmul.f32 0.6931472, %v1023_v61  ;;  %1028 = vlog2.f32 %v1422_v56  ;;  %v1025_v8 = vpop.eup %1024  ;;  %v493_v12 = vmul.f32 0.25, %v1422_v56 }
  0xd2   :  { %v356_v6 = vmul.f32 2.0, %v209_v0  ;;  %v375_v10 = vsub.f32 %v343_v52, %v359_v63  ;;  %v379_v11 = vsub.f32 %v347_v54, %v363_v3  ;;  %1030 = vlog2.f32 %v1420_v55 }
  0xd3   :  { %v368_v14 = vsub.f32 %v1382_v19, %v352_v5  ;;  %v489_v16 = vmul.f32 0.25, %v1420_v55  ;;  %v509_v22 = vsub.f32 1.0, %v493_v12  ;;  %v465_v29 = vmul.f32 -15.0, %v434_v7 }
  0xd4   :  { %v372_v15 = vsub.f32 %v340_v50, %v356_v6  ;;  %v1027_v17 = vpop.eup %1026  ;;  %v394_v18 = vsel %vm384_vm1, %v375_v10, 1.0  ;;  %v398_v20 = vsel %vm384_vm1, %v379_v11, 1.0  ;;  %v442_v38 = vmul.f32 0.6931472, %v1025_v8 }
  0xd5   :  { %v410_v27 = vmax.f32 %v394_v18, 0.25  ;;  %v387_v1 = vsel %vm384_vm1, %v368_v14, 1.0  ;;  %v514_v30 = vmul.f32 0.6931472, %v1027_v17  ;;  %1032 = vlog2.f32 %v509_v22 }
  0xd6   :  { %v391_v19 = vsel %vm384_vm1, %v372_v15, 1.0  ;;  %v414_v33 = vmax.f32 %v398_v20, 0.25  ;;  %v403_v34 = vmax.f32 %v387_v1, 0.25  ;;  %v505_v37 = vsub.f32 1.0, %v489_v16 }
  0xd7   :  { %v1029_v32 = vpop.eup %1028  ;;  %v219_v35 = vpop.f32.mrf.mxu2  ;;  %v1448_v42 = vmin.f32 %v410_v27, 3.999  ;;  %v407_v43 = vmax.f32 %v391_v19, 0.25  ;;  %v545_v50 = vmul.f32 14.5, %v514_v30  ;;  %vm751_vm15 = vcmp.lt.f32.partialorder %v1422_v56, 1.96 }
  0xd8   :  { %v229_v36 = vpop.f32.mrf.mxu3  ;;  %v1031_v41 = vpop.eup %1030  ;;  %v360_v44 = vmul.f32 2.0, %v219_v35  ;;  %v458_v52 = vmul.f32 0.6931472, %v1029_v32  ;;  %1034 = vlog2.f32 %v505_v37  ;;  %v1452_v58 = vmin.f32 %v414_v33, 3.999 }
  0xd9   :  { %v364_v45 = vmul.f32 2.0, %v229_v36  ;;  %v201_v46 = vpop.f32.mrf.mxu0  ;;  %v211_v47 = vpop.f32.mrf.mxu1  ;;  %v450_v57 = vmul.f32 0.6931472, %v1031_v41  ;;  %v1456_v60 = vsub.f32 %v465_v29, %v545_v50  ;;  %1036 = vlog2.f32 %v501_v23 }
  0xda   :  { %v353_v48 = vmul.f32 2.0, %v201_v46  ;;  %v357_v49 = vmul.f32 2.0, %v211_v47  ;;  %v376_v53 = vsub.f32 %v1416_v51, %v360_v44  ;;  %v469_v51 = vmul.f32 -15.0, %v442_v38 }
  0xdb   :  { %v380_v54 = vsub.f32 %v1403_v40, %v364_v45  ;;  %v1033_v62 = vpop.eup %1032  ;;  %v1462_v40 = vmin.f32 %v403_v34, 3.999  ;;  %v1464_v4 = vmin.f32 %v407_v43, 3.999  ;;  %577 = vmax.xlane.f32.xlu1 %v1456_v60  ;;  %v477_v0 = vmul.f32 -15.0, %v458_v52 }
  0xdc   :  { %v369_v59 = vsub.f32 %v1394_v31, %v353_v48  ;;  %v373_v61 = vsub.f32 %v1400_v39, %v357_v49  ;;  %v395_v63 = vsel %vm384_vm1, %v376_v53, 1.0  ;;  %v538_v5 = vmul.f32 0.6931472, %v1033_v62 }
  0xdd   :  { %v399_v3 = vsel %vm384_vm1, %v380_v54, 1.0  ;;  %v473_v6 = vmul.f32 -15.0, %v450_v57  ;;  %1038 = vlog2.f32 %v1448_v42  ;;  %v411_v7 = vmax.f32 %v395_v63, 0.25 }
  0xde   :  { %v388_v31 = vsel %vm384_vm1, %v369_v59, 1.0  ;;  %v392_v39 = vsel %vm384_vm1, %v373_v61, 1.0  ;;  %v415_v8 = vmax.f32 %v399_v3, 0.25  ;;  %v490_v11 = vmul.f32 0.25, %v1448_v42  ;;  %v1035_v12 = vpop.eup %1034 }
  0xdf   :  { %v221_v9 = vpop.f32.mrf.mxu2  ;;  %1040 = vlog2.f32 %v1440_v24  ;;  %v404_v14 = vmax.f32 %v388_v31, 0.25  ;;  %v408_v15 = vmax.f32 %v392_v39, 0.25  ;;  %v557_v18 = vmul.f32 14.5, %v538_v5  ;;  %v1037_v27 = vpop.eup %1036 }
  0xe0   :  { %v231_v10 = vpop.f32.mrf.mxu3  ;;  %v361_v16 = vmul.f32 2.0, %v221_v9  ;;  %v530_v20 = vmul.f32 0.6931472, %v1035_v12  ;;  %v506_v22 = vsub.f32 1.0, %v490_v11  ;;  %v482_v23 = vmul.f32 0.25, %v1440_v24 }
  0xe1   :  { %v365_v17 = vmul.f32 2.0, %v231_v10  ;;  %1042 = vlog2.f32 %v1452_v58  ;;  %v494_v29 = vmul.f32 0.25, %v1452_v58  ;;  %v1479_v30 = vsub.f32 %v477_v0, %v557_v18 }
  0xe2   :  { %v377_v1 = vsub.f32 %v1386_v21, %v361_v16  ;;  %v553_v32 = vmul.f32 14.5, %v530_v20  ;;  %v522_v33 = vmul.f32 0.6931472, %v1037_v27  ;;  %1044 = vlog2.f32 %v506_v22 }
  0xe3   :  { %v381_v19 = vsub.f32 %v1431_v13, %v365_v17  ;;  %v1039_v34 = vpop.eup %1038  ;;  %v1481_v35 = vmin.f32 %v411_v7, 3.999  ;;  %v498_v37 = vsub.f32 1.0, %v482_v23  ;;  %v510_v38 = vsub.f32 1.0, %v494_v29  ;;  %601 = vmax.xlane.f32.xlu0 %v1479_v30 }
  0xe4   :  { %v1487_v13 = vsel %vm384_vm1, %v377_v1, 1.0  ;;  %v1490_v43 = vsub.f32 %v473_v6, %v553_v32  ;;  %v549_v44 = vmul.f32 14.5, %v522_v33  ;;  %v1492_v45 = vmin.f32 %v415_v8, 3.999 }
  0xe5   :  { %v400_v36 = vsel %vm384_vm1, %v381_v19, 1.0  ;;  %v1041_v21 = vpop.eup %1040  ;;  %v1494_v46 = vmin.f32 %v404_v14, 3.999  ;;  %1046 = vlog2.f32 %v498_v37  ;;  %v486_v47 = vmul.f32 0.25, %v1446_v28 }
  0xe6   :  { %v416_v41 = vmax.f32 %v400_v36, 0.25  ;;  %v1497_v48 = vmin.f32 %v408_v15, 3.999  ;;  %593 = vmax.xlane.f32.xlu2 %v1490_v43  ;;  %v1500_v49 = vsub.f32 %v469_v51, %v549_v44  ;;  %v452_v50 = vmul.f32 0.6931472, %v1039_v34 }
  0xe7   :  { %1048 = vlog2.f32 %v510_v38  ;;  %v1043_v52 = vpop.eup %1042  ;;  %v412_v53 = vmax.f32 %v1487_v13, 0.25  ;;  %v436_v54 = vmul.f32 0.6931472, %v1041_v21  ;;  %v502_v57 = vsub.f32 1.0, %v486_v47 }
  0xe8   :  { %1050 = vlog2.f32 %v1446_v28  ;;  %v1045_v59 = vpop.eup %1044  ;;  %v1504_v61 = vmin.f32 %v416_v41, 3.999  ;;  %585 = vmax.xlane.f32.xlu1 %v1500_v49  ;;  %v483_v62 = vmul.f32 0.25, %v1462_v40  ;;  %v491_v63 = vmul.f32 0.25, %v1481_v35  ;;  %v1526_v41 = vpop.permute.xlu1 %675 }
  0xe9   :  { %1052 = vlog2.f32 %v1462_v40  ;;  %v532_v3 = vmul.f32 0.6931472, %v1045_v59  ;;  %v495_v51 = vmul.f32 0.25, %v1492_v45  ;;  %v487_v31 = vmul.f32 0.25, %v1464_v4 }
  0xea   :  { %1054 = vlog2.f32 %v502_v57  ;;  %v474_v39 = vmul.f32 -15.0, %v452_v50  ;;  %v499_v0 = vsub.f32 1.0, %v483_v62  ;;  %v507_v5 = vsub.f32 1.0, %v491_v63 }
  0xeb   :  { %1056 = vlog2.f32 %v1481_v35  ;;  %v1047_v6 = vpop.eup %1046  ;;  %v554_v7 = vmul.f32 14.5, %v532_v3  ;;  %v460_v8 = vmul.f32 0.6931472, %v1043_v52  ;;  %v511_v9 = vsub.f32 1.0, %v495_v51 }
  0xec   :  { %1058 = vlog2.f32 %v1492_v45  ;;  %v516_v11 = vmul.f32 0.6931472, %v1047_v6  ;;  %v503_v12 = vsub.f32 1.0, %v487_v31  ;;  %v488_v14 = vmul.f32 0.25, %v1497_v48 }
  0xed   :  { %v1049_v10 = vpop.eup %1048  ;;  %1060 = vlog2.f32 %v499_v0  ;;  %v1515_v16 = vsub.f32 %v474_v39, %v554_v7  ;;  %v466_v17 = vmul.f32 -15.0, %v436_v54  ;;  %v496_v27 = vmul.f32 0.25, %v1504_v61 }
  0xee   :  { %v1051_v15 = vpop.eup %1050  ;;  %v540_v18 = vmul.f32 0.6931472, %v1049_v10  ;;  %1062 = vlog2.f32 %v507_v5  ;;  %v546_v22 = vmul.f32 14.5, %v516_v11  ;;  %v504_v23 = vsub.f32 1.0, %v488_v14 }
  0xef   :  { %v1053_v20 = vpop.eup %1052  ;;  %1064 = vlog2.f32 %v511_v9  ;;  %595 = vmax.xlane.f32.xlu0 %v1515_v16  ;;  %v478_v19 = vmul.f32 -15.0, %v460_v8  ;;  %v484_v32 = vmul.f32 0.25, %v1494_v46  ;;  %v444_v44 = vmul.f32 0.6931472, %v1051_v15 }
  0xf0   :  { %v1055_v1 = vpop.eup %1054  ;;  %v558_v29 = vmul.f32 14.5, %v540_v18  ;;  %1066 = vlog2.f32 %v1464_v4  ;;  %v1521_v34 = vsub.f32 %v466_v17, %v546_v22  ;;  %v438_v21 = vmul.f32 0.6931472, %v1053_v20 }
  0xf1   :  { %v1057_v33 = vpop.eup %1056  ;;  %v524_v36 = vmul.f32 0.6931472, %v1055_v1  ;;  %1068 = vlog2.f32 %v503_v12  ;;  %v512_v50 = vsub.f32 1.0, %v496_v27  ;;  %v1529_v54 = vmin.f32 %v412_v53, 3.999 }
  0xf2   :  { %v1059_v37 = vpop.eup %1058  ;;  %v1523_v38 = vsub.f32 %v478_v19, %v558_v29  ;;  %1070 = vlog2.f32 %v1497_v48  ;;  %579 = vmax.xlane.f32.xlu2 %v1521_v34  ;;  %v454_v47 = vmul.f32 0.6931472, %v1057_v33  ;;  %v500_v59 = vsub.f32 1.0, %v484_v32  ;;  %v685_v19 = vpop.permute.xlu1 %684 }
  0xf3   :  { %v1061_v13 = vpop.eup %1060  ;;  %1072 = vlog2.f32 %v504_v23  ;;  %v550_v63 = vmul.f32 14.5, %v524_v36  ;;  %v467_v31 = vmul.f32 -15.0, %v438_v21  ;;  %v470_v5 = vmul.f32 -15.0, %v444_v44 }
  0xf4   :  { %v1063_v52 = vpop.eup %1062  ;;  %603 = vmax.xlane.f32.xlu1 %v1523_v38  ;;  %v518_v57 = vmul.f32 0.6931472, %v1061_v13  ;;  %v475_v6 = vmul.f32 -15.0, %v454_v47  ;;  %1074 = vlog2.f32 %v512_v50  ;;  %v492_v10 = vmul.f32 0.25, %v1529_v54 }
  0xf5   :  { %v1065_v62 = vpop.eup %1064  ;;  %v534_v3 = vmul.f32 0.6931472, %v1063_v52  ;;  %1076 = vlog2.f32 %v500_v59  ;;  %v1535_v12 = vsub.f32 %v470_v5, %v550_v63  ;;  %v462_v20 = vmul.f32 0.6931472, %v1059_v37  ;;  %v1551_v59 = vld [vmem:[%s1772_s5] ss:$0 sm:$0xff] }
  0xf6   :  { %v1067_v51 = vpop.eup %1066  ;;  %v547_v39 = vmul.f32 14.5, %v518_v57  ;;  %v542_v14 = vmul.f32 0.6931472, %v1065_v62  ;;  %1078 = vlog2.f32 %v1504_v61  ;;  %v508_v27 = vsub.f32 1.0, %v492_v10 }
  0xf7   :  { %v1069_v0 = vpop.eup %1068  ;;  %v555_v7 = vmul.f32 14.5, %v534_v3  ;;  %v446_v17 = vmul.f32 0.6931472, %v1067_v51  ;;  %1080 = vlog2.f32 %v1494_v46  ;;  %v479_v13 = vmul.f32 -15.0, %v462_v20 }
  0xf8   :  { %v1071_v8 = vpop.eup %1070  ;;  %v1532_v9 = vsub.f32 %v467_v31, %v547_v39  ;;  %v526_v53 = vmul.f32 0.6931472, %v1069_v0  ;;  %v559_v29 = vmul.f32 14.5, %v542_v14  ;;  %1082 = vlog2.f32 %v508_v27  ;;  %v682_v31 = vpop.permute.xlu0 %681  ;;  %v671_v27 = vld [vmem:[%s1771_s4 + $0x70] sm:$0xff] }
  0xf9   :  { %v1073_v11 = vpop.eup %1072  ;;  %v1539_v15 = vsub.f32 %v475_v6, %v555_v7  ;;  %v448_v23 = vmul.f32 0.6931472, %v1071_v8  ;;  %v471_v33 = vmul.f32 -15.0, %v446_v17  ;;  %1084 = vlog2.f32 %v1529_v54 }
  0xfa   :  { %581 = vmax.xlane.f32.xlu0 %v1532_v9  ;;  %v528_v18 = vmul.f32 0.6931472, %v1073_v11  ;;  %587 = vmax.xlane.f32.xlu2 %v1535_v12  ;;  %v551_v22 = vmul.f32 14.5, %v526_v53  ;;  %v1075_v1 = vpop.eup %1074  ;;  %v1546_v37 = vsub.f32 %v479_v13, %v559_v29  ;;  %vm741_vm2 = vcmp.lt.f32.partialorder %v1462_v40, 1.96  ;;  %v694_v6 = vpop.permute.xlu1 %693 }
  0xfb   :  { %v1077_v32 = vpop.eup %1076  ;;  %v472_v50 = vmul.f32 -15.0, %v448_v23  ;;  %v544_v52 = vmul.f32 0.6931472, %v1075_v1  ;;  %vm725_vm3 = vcmp.ne.s32.totalorder %v682_v31, %v1551_v59  ;;  %vm745_vm4 = vcmp.lt.f32.partialorder %v1464_v4, 1.96  ;;  %v672_v23 = vld [vmem:[%s1771_s4 + $0x78] sm:$0xff]  ;;  %v1595_v1 = vpop.permute.xlu2 %678 }
  0xfc   :  { %597 = vmax.xlane.f32.xlu1 %v1539_v15  ;;  %v552_v36 = vmul.f32 14.5, %v528_v18  ;;  %v1079_v21 = vpop.eup %1078  ;;  %v1544_v47 = vsub.f32 %v471_v33, %v551_v22  ;;  %v520_v57 = vmul.f32 0.6931472, %v1077_v32  ;;  %vm1562_vm5 = vmand %vm725_vm3, %vm741_vm2  ;;  %vm729_vm6 = vcmp.ne.s32.totalorder %v694_v6, %v1551_v59 }
  0xfd   :  { %v1081_v44 = vpop.eup %1080  ;;  %v464_v63 = vmul.f32 0.6931472, %v1079_v21  ;;  %v560_v51 = vmul.f32 14.5, %v544_v52  ;;  %vm1571_vm7 = vmand %vm729_vm6, %vm745_vm4  ;;  %vm742_vm8 = vcmp.lt.f32.partialorder %v1494_v46, 1.96  ;;  %vm726_vm9 = vcmp.ne.s32.totalorder %v685_v19, %v1551_v59  ;;  %v670_v46 = vld [vmem:[%s1771_s4 + $0x68] sm:$0xff] }
  0xfe   :  { %v1554_v62 = vsub.f32 %v472_v50, %v552_v36  ;;  %v440_v3 = vmul.f32 0.6931472, %v1081_v44  ;;  %v548_v39 = vmul.f32 14.5, %v520_v57  ;;  %v1083_v0 = vpop.eup %1082  ;;  %vm1579_vm10 = vmand %vm726_vm9, %vm742_vm8  ;;  %vm723_vm12 = vcmp.ne.s32.totalorder %v1526_v41, %v1551_v59  ;;  %s1177_s4 = smov [#allocation2]  }
  0xff   :  { %v480_v5 = vmul.f32 -15.0, %v464_v63  ;;  %v1085_v53 = vpop.eup %1084  ;;  %v536_v11 = vmul.f32 0.6931472, %v1083_v0  ;;  %vm755_vm13 = vmand %vm723_vm12, %vm739_vm11  ;;  %vm747_vm2 = vcmp.lt.f32.partialorder %v1420_v55, 1.96  ;;  %s887_s18 = sshll.u32 %s1177_s4, 4  ;;  %s888_s18 = int_to_ptr.vmem [resolvable:$true] %s887_s18 }
 0x100   :  { %v468_v7 = vmul.f32 -15.0, %v440_v3  ;;  %v456_v4 = vmul.f32 0.6931472, %v1085_v53  ;;  %v688_v19 = vpop.permute.xlu0 %687  ;;  %vm771_vm14 = vmand %vm755_vm13, %vm384_vm1  ;;  %vm743_vm6 = vcmp.lt.f32.partialorder %v1391_v26, 1.96 }
 0x101   :  { %v1567_v10 = vsub.f32 %v480_v5, %v560_v51  ;;  %v556_v17 = vmul.f32 14.5, %v536_v11  ;;  %vm727_vm9 = vcmp.ne.s32.totalorder %v688_v19, %v1551_v59 }
 0x102   :  { %589 = vmax.xlane.f32.xlu0 %v1544_v47  ;;  %605 = vmax.xlane.f32.xlu2 %v1546_v37  ;;  %v1569_v40 = vsub.f32 %v468_v7, %v548_v39  ;;  %v476_v20 = vmul.f32 -15.0, %v456_v4  ;;  %v703_v32 = vpop.permute.xlu1 %702  ;;  %vm759_vm12 = vmand %vm727_vm9, %vm743_vm6 }
 0x103   :  { %v1597_v29 = vpop.permute.xlu2 %690 }
 0x104   :  { %591 = vmax.xlane.f32.xlu1 %v1554_v62  ;;  %v1583_v22 = vsub.f32 %v476_v20, %v556_v17 }
 0x108   :  { %v1599_v33 = vpop.permute.xlu0 %696 }
 0x10a   :  { %607 = vmax.xlane.f32.xlu0 %v1567_v10  ;;  %583 = vmax.xlane.f32.xlu2 %v1569_v40  ;;  %v712_v21 = vpop.permute.xlu1 %711 }
 0x10b   :  { %v700_v36 = vpop.permute.xlu2 %699  ;;  %vm735_vm0 = vcmp.ne.s32.totalorder %v712_v21, %v1551_v59 }
 0x10c   :  { %vm767_vm3 = vmand %vm735_vm0, %vm751_vm15  ;;  %vm731_vm4 = vcmp.ne.s32.totalorder %v700_v36, %v1551_v59  ;;  %vm748_vm15 = vcmp.lt.f32.partialorder %v1448_v42, 1.96  ;;  %vm732_vm0 = vcmp.ne.s32.totalorder %v703_v32, %v1551_v59 }
 0x10d   :  { %vm763_vm8 = vmand %vm731_vm4, %vm747_vm2  ;;  %vm724_vm4 = vcmp.ne.s32.totalorder %v1595_v1, %v1551_v59 }
 0x10e   :  { %vm783_vm11 = vmand %vm767_vm3, %vm384_vm1  ;;  %vm740_vm3 = vcmp.lt.f32.partialorder %v1440_v24, 1.96 }
 0x10f   :  { %vm779_vm13 = vmand %vm763_vm8, %vm384_vm1 }
 0x110   :  { %v1601_v13 = vpop.permute.xlu0 %705  ;;  %vm764_vm2 = vmand %vm732_vm0, %vm748_vm15 }
 0x111   :  { %vm780_vm6 = vmand %vm764_vm2, %vm384_vm1 }
 0x112   :  { %599 = vmax.xlane.f32.xlu2 %v1583_v22  ;;  %vm756_vm8 = vmand %vm724_vm4, %vm740_vm3  ;;  %vm746_vm4 = vcmp.lt.f32.partialorder %v1497_v48, 1.96 }
 0x113   :  { %v1604_v52 = vpop.permute.xlu2 %708  ;;  %vm772_vm9 = vmand %vm756_vm8, %vm384_vm1 }
 0x11d   :  { %720 = vperm.xlu1 %1018, %v672_v23  }
 0x11e   :  { %714 = vperm.xlu0 %1017, %v670_v46  }
 0x12a   :  { %717 = vperm.xlu2 %1019, %v671_v27  }
 0x14e   :  { %v578_v44 = vpop.xlane.xlu1 %577 }
 0x14f   :  { %v609_v50 = vsub.f32 %v1456_v60, %v578_v44 }
 0x151   :  { %v625_v57 = vmul.f32 1.442695, %v609_v50 }
 0x153   :  { %1086 = vpow2.f32 %v625_v57 }
 0x156   :  { %v602_v63 = vpop.xlane.xlu0 %601 }
 0x157   :  { %v621_v3 = vsub.f32 %v1479_v30, %v602_v63 }
 0x159   :  { %v594_v51 = vpop.xlane.xlu2 %593  ;;  %v1087_v31 = vpop.eup %1086  ;;  %v649_v39 = vmul.f32 1.442695, %v621_v3 }
 0x15a   :  { %v617_v0 = vsub.f32 %v1490_v43, %v594_v51  ;;  %v1613_v5 = vsel %vm771_vm14, %v1087_v31, 0.0  ;;  %vm775_vm14 = vmand %vm759_vm12, %vm384_vm1  ;;  %vm749_vm12 = vcmp.lt.f32.partialorder %v1481_v35, 1.96 }
 0x15b   :  { %v586_v60 = vpop.xlane.xlu1 %585  ;;  %1088 = vpow2.f32 %v649_v39  ;;  %803 = vadd.xlane.f32.xlu0 %v1613_v5 }
 0x15c   :  { %v641_v25 = vmul.f32 1.442695, %v617_v0  ;;  %v613_v6 = vsub.f32 %v1500_v49, %v586_v60 }
 0x15e   :  { %1090 = vpow2.f32 %v641_v25  ;;  %v633_v30 = vmul.f32 1.442695, %v613_v6 }
 0x160   :  { %1092 = vpow2.f32 %v633_v30 }
 0x161   :  { %v1089_v43 = vpop.eup %1088 }
 0x162   :  { %v596_v49 = vpop.xlane.xlu0 %595  ;;  %v1626_v41 = vsel %vm783_vm11, %v1089_v43, 0.0  ;;  %vm744_vm11 = vcmp.lt.f32.partialorder %v1446_v28, 1.96 }
 0x163   :  { %v618_v56 = vsub.f32 %v1515_v16, %v596_v49  ;;  %827 = vadd.xlane.f32.xlu0 %v1626_v41 }
 0x164   :  { %v1091_v55 = vpop.eup %1090 }
 0x165   :  { %v643_v26 = vmul.f32 1.442695, %v618_v56  ;;  %v580_v7 = vpop.xlane.xlu2 %579  ;;  %v1631_v53 = vsel %vm779_vm13, %v1091_v55, 0.0  ;;  %vm728_vm13 = vcmp.ne.s32.totalorder %v1597_v29, %v1551_v59 }
 0x166   :  { %v1093_v11 = vpop.eup %1092  ;;  %v610_v4 = vsub.f32 %v1521_v34, %v580_v7  ;;  %819 = vadd.xlane.f32.xlu1 %v1631_v53  ;;  %vm760_vm15 = vmand %vm728_vm13, %vm744_vm11  ;;  %vm734_vm13 = vcmp.ne.s32.totalorder %v1604_v52, %v1551_v59 }
 0x167   :  { %v1634_v17 = vpop.xlane.xlu1 %603  ;;  %1094 = vpow2.f32 %v643_v26  ;;  %v1640_v16 = vsel %vm775_vm14, %v1093_v11, 0.0  ;;  %vm733_vm14 = vcmp.ne.s32.totalorder %v1601_v13, %v1551_v59  ;;  %vm776_vm2 = vmand %vm760_vm15, %vm384_vm1 }
 0x168   :  { %v627_v20 = vmul.f32 1.442695, %v610_v4  ;;  %811 = vadd.xlane.f32.xlu2 %v1640_v16  ;;  %vm765_vm0 = vmand %vm733_vm14, %vm749_vm12  ;;  %v622_v14 = vsub.f32 %v1523_v38, %v1634_v17 }
 0x169   :  { %vm781_vm3 = vmand %vm765_vm0, %vm384_vm1 }
 0x16a   :  { %1096 = vpow2.f32 %v627_v20  ;;  %vm773_vm11 = vmand %vm1562_vm5, %vm384_vm1  ;;  %v651_v55 = vmul.f32 1.442695, %v622_v14 }
 0x16b   :  { %vm774_vm5 = vmand %vm1579_vm10, %vm384_vm1  ;;  %vm753_vm10 = vcmp.lt.f32.partialorder %v1492_v45, 1.96 }
 0x16d   :  { %v582_v34 = vpop.xlane.xlu0 %581  ;;  %v1095_v42 = vpop.eup %1094 }
 0x16e   :  { %v588_v23 = vpop.xlane.xlu2 %587  ;;  %v1650_v19 = vsel %vm780_vm6, %v1095_v42, 0.0  ;;  %v611_v1 = vsub.f32 %v1532_v9, %v582_v34  ;;  %vm730_vm6 = vcmp.ne.s32.totalorder %v1599_v33, %v1551_v59 }
 0x16f   :  { %v614_v46 = vsub.f32 %v1535_v12, %v588_v23  ;;  %v598_v27 = vpop.xlane.xlu1 %597  ;;  %821 = vadd.xlane.f32.xlu0 %v1650_v19  ;;  %vm762_vm8 = vmand %vm730_vm6, %vm746_vm4 }
 0x170   :  { %v619_v32 = vsub.f32 %v1539_v15, %v598_v27  ;;  %v1097_v24 = vpop.eup %1096  ;;  %v629_v12 = vmul.f32 1.442695, %v611_v1  ;;  %vm778_vm12 = vmand %vm762_vm8, %vm384_vm1  ;;  %vm752_vm8 = vcmp.lt.f32.partialorder %v1452_v58, 1.96 }
 0x171   :  { %v635_v36 = vmul.f32 1.442695, %v614_v46  ;;  %v1657_v44 = vsel %vm772_vm9, %v1097_v24, 0.0  ;;  %vm777_vm9 = vmand %vm1571_vm7, %vm384_vm1  ;;  %vm750_vm7 = vcmp.lt.f32.partialorder %v1529_v54, 1.96 }
 0x172   :  { %v645_v21 = vmul.f32 1.442695, %v619_v32  ;;  %805 = vadd.xlane.f32.xlu2 %v1657_v44  ;;  %vm766_vm14 = vmand %vm734_vm13, %vm750_vm7 }
 0x173   :  { %1098 = vpow2.f32 %v635_v36  ;;  %vm782_vm0 = vmand %vm766_vm14, %vm384_vm1 }
 0x174   :  { %1100 = vpow2.f32 %v645_v21 }
 0x175   :  { %v590_v15 = vpop.xlane.xlu0 %589  ;;  %1102 = vpow2.f32 %v629_v12 }
 0x176   :  { %v606_v9 = vpop.xlane.xlu2 %605  ;;  %v615_v50 = vsub.f32 %v1544_v47, %v590_v15 }
 0x177   :  { %v592_v57 = vpop.xlane.xlu1 %591  ;;  %v623_v38 = vsub.f32 %v1546_v37, %v606_v9 }
 0x178   :  { %v637_v63 = vmul.f32 1.442695, %v615_v50  ;;  %v616_v28 = vsub.f32 %v1554_v62, %v592_v57 }
 0x179   :  { %v1099_v3 = vpop.eup %1098 }
 0x17a   :  { %v1101_v35 = vpop.eup %1100  ;;  %1104 = vpow2.f32 %v637_v63  ;;  %v639_v29 = vmul.f32 1.442695, %v616_v28  ;;  %v1670_v51 = vsel %vm776_vm2, %v1099_v3, 0.0 }
 0x17b   :  { %813 = vadd.xlane.f32.xlu1 %v1670_v51  ;;  %v1675_v47 = vsel %vm781_vm3, %v1101_v35, 0.0  ;;  %v1103_v13 = vpop.eup %1102  ;;  %vm754_vm3 = vcmp.lt.f32.partialorder %v1504_v61, 1.96 }
 0x17c   :  { %1106 = vpow2.f32 %v639_v29  ;;  %823 = vadd.xlane.f32.xlu2 %v1675_v47  ;;  %v1692_v25 = vsel %vm773_vm11, %v1103_v13, 0.0 }
 0x17d   :  { %v608_v60 = vpop.xlane.xlu0 %607 }
 0x17e   :  { %v584_v62 = vpop.xlane.xlu2 %583  ;;  %v624_v8 = vsub.f32 %v1567_v10, %v608_v60 }
 0x17f   :  { %v612_v31 = vsub.f32 %v1569_v40, %v584_v62 }
 0x180   :  { %v1105_v39 = vpop.eup %1104  ;;  %v655_v49 = vmul.f32 1.442695, %v624_v8 }
 0x181   :  { %v631_v0 = vmul.f32 1.442695, %v612_v31  ;;  %v1690_v48 = vsel %vm777_vm9, %v1105_v39, 0.0 }
 0x182   :  { %v1107_v33 = vpop.eup %1106  ;;  %815 = vadd.xlane.f32.xlu0 %v1690_v48 }
 0x183   :  { %1108 = vpow2.f32 %v631_v0  ;;  %807 = vadd.xlane.f32.xlu1 %v1692_v25  ;;  %v1698_v40 = vsel %vm778_vm12, %v1107_v33, 0.0 }
 0x184   :  { %817 = vadd.xlane.f32.xlu2 %v1698_v40 }
 0x186   :  { %v600_v6 = vpop.xlane.xlu2 %599 }
 0x187   :  { %v620_v30 = vsub.f32 %v1583_v22, %v600_v6  ;;  %v653_v22 = vmul.f32 1.442695, %v623_v38 }
 0x189   :  { %v1109_v43 = vpop.eup %1108  ;;  %v647_v56 = vmul.f32 1.442695, %v620_v30 }
 0x18a   :  { %v1710_v26 = vsel %vm774_vm5, %v1109_v43, 0.0 }
 0x18b   :  { %1110 = vpow2.f32 %v647_v56  ;;  %809 = vadd.xlane.f32.xlu0 %v1710_v26 }
 0x18c   :  { %1112 = vpow2.f32 %v655_v49 }
 0x18d   :  { %1114 = vpow2.f32 %v651_v55 }
 0x18e   :  { %v718_v10 = vpop.permute.xlu2 %717  ;;  %1116 = vpow2.f32 %v653_v22 }
 0x18f   :  { %vm737_vm15 = vcmp.ne.s32.totalorder %v718_v10, %v1551_v59  ;;  %v721_v54 = vpop.permute.xlu1 %720 }
 0x190   :  { %vm1720_vm2 = vmand %vm737_vm15, %vm753_vm10  ;;  %vm738_vm4 = vcmp.ne.s32.totalorder %v721_v54, %v1551_v59  ;;  %v715_v37 = vpop.permute.xlu0 %714 }
 0x191   :  { %v1111_v52 = vpop.eup %1110  ;;  %vm770_vm6 = vmand %vm738_vm4, %vm754_vm3  ;;  %vm736_vm9 = vcmp.ne.s32.totalorder %v715_v37, %v1551_v59 }
 0x192   :  { %vm768_vm11 = vmand %vm736_vm9, %vm752_vm8  ;;  %v1728_v45 = vsel %vm782_vm0, %v1111_v52, 0.0  ;;  %v1113_v7 = vpop.eup %1112 }
 0x193   :  { %825 = vadd.xlane.f32.xlu1 %v1728_v45  ;;  %vm786_vm12 = vmand %vm770_vm6, %vm384_vm1  ;;  %v1115_v61 = vpop.eup %1114 }
 0x194   :  { %v1733_v11 = vsel %vm786_vm12, %v1113_v7, 0.0  ;;  %vm784_vm5 = vmand %vm768_vm11, %vm384_vm1  ;;  %v1117_v59 = vpop.eup %1116 }
 0x195   :  { %833 = vadd.xlane.f32.xlu0 %v1733_v11  ;;  %v1738_v58 = vsel %vm784_vm5, %v1115_v61, 0.0  ;;  %vm785_vm7 = vmand %vm1720_vm2, %vm384_vm1 }
 0x196   :  { %829 = vadd.xlane.f32.xlu2 %v1738_v58  ;;  %v1745_v4 = vsel %vm785_vm7, %v1117_v59, 0.0 }
 0x19b   :  { %831 = vadd.xlane.f32.xlu1 %v1745_v4 }
 0x1ce   :  { %v804_v17 = vpop.xlane.xlu0 %803 }
 0x1cf   :  { %1118 = vrcp.f32 %v804_v17 }
 0x1d5   :  { %v1119_v20 = vpop.eup %1118 }
 0x1d6   :  { %v851_v34 = vmul.f32 %v1119_v20, %v1613_v5  ;;  %v828_v42 = vpop.xlane.xlu0 %827 }
 0x1d7   :  { %1120 = vrcp.f32 %v828_v42 }
 0x1d8   :  { %867 = vst [vmem:[#allocation2] sm:$0xff] %v851_v34 }
 0x1d9   :  { %v820_v23 = vpop.xlane.xlu1 %819 }
 0x1da   :  { %1122 = vrcp.f32 %v820_v23 }
 0x1db   :  { %v812_v46 = vpop.xlane.xlu2 %811 }
 0x1dc   :  { %1124 = vrcp.f32 %v812_v46 }
 0x1dd   :  { %v1121_v2 = vpop.eup %1120 }
 0x1de   :  { %v863_v27 = vmul.f32 %v1121_v2, %v1626_v41 }
 0x1e0   :  { %v1123_v32 = vpop.eup %1122  ;;  %879 = vst [vmem:[#allocation2 + $0x60] sm:$0xff] %v863_v27 }
 0x1e1   :  { %v859_v24 = vmul.f32 %v1123_v32, %v1631_v53 }
 0x1e2   :  { %v1125_v36 = vpop.eup %1124  ;;  %v822_v1 = vpop.xlane.xlu0 %821 }
 0x1e3   :  { %875 = vst [vmem:[#allocation2 + $0x40] sm:$0xff] %v859_v24  ;;  %v855_v21 = vmul.f32 %v1125_v36, %v1640_v16  ;;  %1126 = vrcp.f32 %v822_v1 }
 0x1e5   :  { %871 = vst [vmem:[#allocation2 + $0x20] sm:$0xff] %v855_v21  ;;  %v806_v5 = vpop.xlane.xlu2 %805 }
 0x1e6   :  { %1128 = vrcp.f32 %v806_v5 }
 0x1e9   :  { %v1127_v12 = vpop.eup %1126 }
 0x1ea   :  { %v860_v15 = vmul.f32 %v1127_v12, %v1650_v19 }
 0x1ec   :  { %v1129_v9 = vpop.eup %1128  ;;  %876 = vst [vmem:[#allocation2 + $0x48] sm:$0xff] %v860_v15 }
 0x1ed   :  { %v852_v41 = vmul.f32 %v1129_v9, %v1657_v44 }
 0x1ee   :  { %v814_v50 = vpop.xlane.xlu1 %813 }
 0x1ef   :  { %1130 = vrcp.f32 %v814_v50  ;;  %v824_v53 = vpop.xlane.xlu2 %823  ;;  %868 = vst [vmem:[#allocation2 + $0x8] sm:$0xff] %v852_v41 }
 0x1f0   :  { %1132 = vrcp.f32 %v824_v53 }
 0x1f5   :  { %v1131_v57 = vpop.eup %1130  ;;  %v816_v63 = vpop.xlane.xlu0 %815 }
 0x1f6   :  { %v1133_v28 = vpop.eup %1132  ;;  %v856_v16 = vmul.f32 %v1131_v57, %v1670_v51  ;;  %v808_v3 = vpop.xlane.xlu1 %807  ;;  %1134 = vrcp.f32 %v816_v63 }
 0x1f7   :  { %v861_v35 = vmul.f32 %v1133_v28, %v1675_v47  ;;  %1136 = vrcp.f32 %v808_v3  ;;  %v818_v19 = vpop.xlane.xlu2 %817 }
 0x1f8   :  { %872 = vst [vmem:[#allocation2 + $0x28] sm:$0xff] %v856_v16  ;;  %1138 = vrcp.f32 %v818_v19 }
 0x1f9   :  { %877 = vst [vmem:[#allocation2 + $0x50] sm:$0xff] %v861_v35 }
 0x1fc   :  { %v1135_v44 = vpop.eup %1134 }
 0x1fd   :  { %v1137_v29 = vpop.eup %1136  ;;  %v857_v62 = vmul.f32 %v1135_v44, %v1690_v48 }
 0x1fe   :  { %v1139_v13 = vpop.eup %1138  ;;  %v853_v31 = vmul.f32 %v1137_v29, %v1692_v25  ;;  %v810_v39 = vpop.xlane.xlu0 %809 }
 0x1ff   :  { %873 = vst [vmem:[#allocation2 + $0x30] sm:$0xff] %v857_v62  ;;  %v858_v51 = vmul.f32 %v1139_v13, %v1698_v40  ;;  %1140 = vrcp.f32 %v810_v39 }
 0x200   :  { %869 = vst [vmem:[#allocation2 + $0x10] sm:$0xff] %v853_v31 }
 0x201   :  { %874 = vst [vmem:[#allocation2 + $0x38] sm:$0xff] %v858_v51 }
 0x205   :  { %v1141_v47 = vpop.eup %1140 }
 0x206   :  { %v854_v0 = vmul.f32 %v1141_v47, %v1710_v26  ;;  %v826_v33 = vpop.xlane.xlu1 %825 }
 0x207   :  { %1142 = vrcp.f32 %v826_v33 }
 0x208   :  { %870 = vst [vmem:[#allocation2 + $0x18] sm:$0xff] %v854_v0  ;;  %v834_v60 = vpop.xlane.xlu0 %833 }
 0x209   :  { %1144 = vrcp.f32 %v834_v60  ;;  %v830_v8 = vpop.xlane.xlu2 %829 }
 0x20a   :  { %1146 = vrcp.f32 %v830_v8 }
 0x20d   :  { %v1143_v48 = vpop.eup %1142 }
 0x20e   :  { %v862_v25 = vmul.f32 %v1143_v48, %v1728_v45  ;;  %v832_v14 = vpop.xlane.xlu1 %831 }
 0x20f   :  { %v1145_v6 = vpop.eup %1144  ;;  %1148 = vrcp.f32 %v832_v14 }
 0x210   :  { %v1147_v40 = vpop.eup %1146  ;;  %878 = vst [vmem:[#allocation2 + $0x58] sm:$0xff] %v862_v25  ;;  %v866_v30 = vmul.f32 %v1145_v6, %v1733_v11 }
 0x211   :  { %v864_v43 = vmul.f32 %v1147_v40, %v1738_v58 }
 0x212   :  { %882 = vst [vmem:[#allocation2 + $0x78] sm:$0xff] %v866_v30 }
 0x213   :  { %880 = vst [vmem:[#allocation2 + $0x68] sm:$0xff] %v864_v43 }
 0x215   :  { %v1149_v49 = vpop.eup %1148 }
 0x216   :  { %v865_v56 = vmul.f32 %v1149_v49, %v1745_v4 }
 0x218   :  { %881 = vst [vmem:[#allocation2 + $0x70] sm:$0xff] %v865_v56 }
 0x219   :  { %895 = dma.vmem_to_hbm [thread:$0]  %s888_s18, 2048, %s890_s21, [#allocation3], %s1178_s22, %s1178_s22, %s1179_s23  }
 0x21a   :  { %1174 = dma.done.wait [#allocation3], 2048  }
 0x21b   :  { %1175 = vsyncadd [#allocation3], 4294965248 }
 0x21c   :  { %900 = vsyncpa [#allocation3], 1 }

</bundles_post_ra>
